<compile_context>
chip_gen: v7x
topology: tpu7x:2x2x1
jax: 0.10.0
libtpu: 0.0.40
codegen_flags: <defaults>
</compile_context>

<pallas_src>
import functools

import jax
import jax.numpy as jnp
from jax.experimental import pallas as pl
from jax.experimental.pallas import tpu as pltpu

LANE = 128


def _round_up(x, m):
    return ((x + m - 1) // m) * m


def _choose_b_tile(B, S, ninp):
    """Batch tile: fill the MXU M dimension (~256 rows when possible), keep
    >=2 grid steps for v7x megacore, and bound the per-step VMEM emb slab."""
    rows_target = 256
    bt = max(1, -(-rows_target // S))
    # Double-buffered bf16 emb tile: keep each buffer <= ~4 MiB so the kernel
    # fits comfortably even at v5e's 16 MiB scoped default.
    bytes_per_sample = max(1, S * ninp * 2)
    bt = min(bt, max(1, (4 * 1024 * 1024) // bytes_per_sample))
    if B >= 2:
        bt = min(bt, B // 2)      # leave >=2 grid steps for the 2 TCs on v7x
    return max(1, min(bt, B))


def _cnn_kernel(emb_ref, cw_ref, cb_ref, lw_ref, lb_ref, out_ref,
                *, fil, stride, L_full):
    # emb_ref: (bt, S, ninp) bf16     cw_ref: (fil, ninp, Hp) bf16
    # cb_ref: (1, Hp) f32             lw_ref: (Hp, Cp) bf16    lb_ref: (1, Cp) f32
    # out_ref: (bt, 1, Cp) f32
    bt, S, ninp = emb_ref.shape
    Hp = cw_ref.shape[2]

    # Fold the batch tile into the matmul M dimension.
    x2 = emb_ref[...].reshape(bt * S, ninp)            # (bt*S, ninp) bf16

    # Conv2d(1, nhid, (fil, ninp)) as `fil` aligned full-length matmuls
    # Z_f = X @ W_f, with the f-shifts applied on the outputs:
    #   conv[b, l, :] = sum_f Z_f[b, l + f, :]
    conv = None
    for f in range(fil):                                # fil is a small static int
        z = jnp.dot(x2, cw_ref[f],
                    preferred_element_type=jnp.float32).reshape(bt, S, Hp)
        zf = z[:, f:f + L_full, :]
        conv = zf if conv is None else conv + zf        # (bt, L_full, Hp) f32

    act = jnp.maximum(conv + cb_ref[...], 0.0)          # bias + ReLU

    # Temporal max-pool.  For stride > 1 only rows l % stride == 0 are valid
    # conv outputs; mask the rest (row l=0 is always valid and ReLU'd >= 0).
    if stride > 1:
        l_idx = jax.lax.broadcasted_iota(jnp.int32, act.shape, 1)
        act = jnp.where(l_idx % stride == 0, act, -jnp.inf)
    pooled = jnp.max(act, axis=1)                        # (bt, Hp) f32

    # Linear(nhid, 4): bf16 MXU feed, f32 accumulation.  Padded hidden rows of
    # lw are zero; padded class columns carry a -1e30 bias so softmax is exact.
    logits = jnp.dot(pooled.astype(jnp.bfloat16), lw_ref[...],
                     preferred_element_type=jnp.float32) + lb_ref[...]   # (bt, Cp)

    m = jnp.max(logits, axis=-1, keepdims=True)
    e = jnp.exp(logits - m)
    probs = e / jnp.sum(e, axis=-1, keepdims=True)
    out_ref[...] = probs.reshape(bt, 1, -1).astype(out_ref.dtype)


def cnn_model_forward(tokens, params, *, fil, stride):
    emb_table = params["emb"]          # (ntoken, ninp)
    conv_w = params["conv_w"]          # (nhid, 1, fil, ninp)  (PyTorch layout)
    conv_b = params["conv_b"]          # (nhid,)
    lin_w = params["lin_w"]            # (4, nhid)             (PyTorch layout)
    lin_b = params["lin_b"]            # (4,)

    B, S = tokens.shape
    _, ninp = emb_table.shape
    nhid = conv_w.shape[0]
    nclass = lin_w.shape[0]
    assert S >= fil, "sequence shorter than the conv filter"
    L_full = S - fil + 1               # stride-1 conv length; stride handled in-kernel

    Hp = _round_up(max(nhid, LANE), LANE)     # lane-padded hidden dim
    Cp = _round_up(max(nclass, LANE), LANE)   # lane-padded class dim

    bt = _choose_b_tile(B, S, ninp)
    B_pad = _round_up(B, bt)

    # ---- wrapper glue: embedding gather + weight repacking (tiny, one-time) ----
    # TODO(synk): fuse the embedding gather into the kernel (scalar-prefetched
    # token ids + per-row DMA gather) to avoid writing/re-reading the emb slab.
    emb = jnp.take(emb_table, tokens, axis=0).astype(jnp.bfloat16)   # (B, S, ninp)
    if B_pad != B:
        emb = jnp.pad(emb, ((0, B_pad - B), (0, 0), (0, 0)))

    cw = jnp.transpose(conv_w.reshape(nhid, fil, ninp), (1, 2, 0))   # (fil, ninp, nhid)
    cw = jnp.pad(cw, ((0, 0), (0, 0), (0, Hp - nhid))).astype(jnp.bfloat16)
    cb = jnp.pad(conv_b.reshape(1, nhid),
                 ((0, 0), (0, Hp - nhid))).astype(jnp.float32)       # (1, Hp)

    lw = jnp.pad(lin_w.T, ((0, Hp - nhid), (0, Cp - nclass))).astype(jnp.bfloat16)
    lb = jnp.pad(lin_b.reshape(1, nclass).astype(jnp.float32),
                 ((0, 0), (0, Cp - nclass)), constant_values=-1e30)  # (1, Cp)

    kernel = functools.partial(_cnn_kernel, fil=fil, stride=stride, L_full=L_full)

    out = pl.pallas_call(
        kernel,
        out_shape=jax.ShapeDtypeStruct((B_pad, 1, Cp), jnp.float32),
        grid=(B_pad // bt,),
        in_specs=[
            pl.BlockSpec((bt, S, ninp), lambda i: (i, 0, 0)),   # batch-blocked emb
            pl.BlockSpec((fil, ninp, Hp), lambda i: (0, 0, 0)),
            pl.BlockSpec((1, Hp), lambda i: (0, 0)),
            pl.BlockSpec((Hp, Cp), lambda i: (0, 0)),
            pl.BlockSpec((1, Cp), lambda i: (0, 0)),
        ],
        out_specs=pl.BlockSpec((bt, 1, Cp), lambda i: (i, 0, 0)),    # lane-dense store
        compiler_params=pltpu.CompilerParams(
            dimension_semantics=("parallel",),
            vmem_limit_bytes=48 * 1024 * 1024),
    )(emb, cw, cb, lw, lb)

    return out[:B, 0, :nclass]                                       # (B, 4)


def init_params(key, ntoken, ninp, nhid, fil):
    """Deterministic synthetic parameters matching the PyTorch module's shapes."""
    k = jax.random.split(key, 5)
    emb = jax.random.normal(k[0], (ntoken, ninp), jnp.float32)            # nn.Embedding
    bc = 1.0 / (1 * fil * ninp) ** 0.5
    conv_w = jax.random.uniform(k[1], (nhid, 1, fil, ninp), jnp.float32, -bc, bc)
    conv_b = jax.random.uniform(k[2], (nhid,), jnp.float32, -bc, bc)
    bl = 1.0 / nhid ** 0.5
    lin_w = jax.random.uniform(k[3], (4, nhid), jnp.float32, -bl, bl)
    lin_b = jax.random.uniform(k[4], (4,), jnp.float32, -bl, bl)
    return dict(emb=emb, conv_w=conv_w, conv_b=conv_b, lin_w=lin_w, lin_b=lin_b)


def reference_forward(tokens, params, *, fil, stride):
    """Pure-JAX f32 reference replicating the PyTorch forward pass."""
    emb = jnp.take(params["emb"], tokens, axis=0)                         # (B, S, ninp)
    B, S, ninp = emb.shape
    nhid = params["conv_w"].shape[0]
    L = (S - fil) // stride + 1
    K = fil * ninp
    patches = jnp.stack(
        [emb[:, t * stride:t * stride + fil, :].reshape(B, K) for t in range(L)],
        axis=1)                                                           # (B, L, K)
    cw = params["conv_w"].reshape(nhid, K)                                # (nhid, K)
    conv = jnp.einsum("blk,hk->blh", patches, cw) + params["conv_b"]      # (B, L, nhid)
    act = jnp.maximum(conv, 0.0)
    pooled = jnp.max(act, axis=1)                                         # (B, nhid)
    logits = pooled @ params["lin_w"].T + params["lin_b"]                 # (B, 4)
    return jax.nn.softmax(logits, axis=1)


if __name__ == "__main__":
    # Small shapes consistent with the module.
    ntoken, fil, stride, ninp, nhid, nlayers = 50, 3, 1, 32, 32, 1
    B, S = 2, 8

    key = jax.random.PRNGKey(0)
    k_tok, k_par = jax.random.split(key)
    tokens = jax.random.randint(k_tok, (B, S), 0, ntoken, dtype=jnp.int32)
    s_len = jnp.full((B,), S, dtype=jnp.int32)   # unused by forward (as in PyTorch)

    params = init_params(k_par, ntoken, ninp, nhid, fil)

    out = cnn_model_forward(tokens, params, fil=fil, stride=stride)
    out = jax.block_until_ready(out)

    ref = reference_forward(tokens, params, fil=fil, stride=stride)
    assert out.shape == (B, 4)
    # bf16 MXU inputs -> relax tolerance vs the f32 reference.
    assert jnp.allclose(out, ref, atol=2e-2, rtol=2e-2), (out, ref)
    assert jnp.allclose(jnp.sum(out, axis=1), 1.0, atol=1e-5)

    print("KERNEL_OK")
</pallas_src>

<mosaic_0001>
module attributes {stable_mosaic.version = 11 : i64} {
  func.func @_cnn_kernel(%arg0: i32, %arg1: memref<1x8x32xbf16, #tpu.memory_space<vmem>>, %arg2: memref<3x32x128xbf16, #tpu.memory_space<vmem>>, %arg3: memref<1x128xf32, #tpu.memory_space<vmem>>, %arg4: memref<128x128xbf16, #tpu.memory_space<vmem>>, %arg5: memref<1x128xf32, #tpu.memory_space<vmem>>, %arg6: memref<1x1x128xf32, #tpu.memory_space<vmem>>) attributes {dimension_semantics = [#tpu.dimension_semantics<parallel>], iteration_bounds = array<i64: 2>, scalar_prefetch = 0 : i64, scratch_operands = 0 : i64, tpu.core_type = #tpu.core_type<tc>, window_params = [{transform_indices = @transform_0, window_bounds = array<i64: 1, 8, 32>}, {pipeline_mode = #tpu.pipeline_mode<synchronous>, transform_indices = @transform_1, window_bounds = array<i64: 3, 32, 128>}, {pipeline_mode = #tpu.pipeline_mode<synchronous>, transform_indices = @transform_2, window_bounds = array<i64: 1, 128>}, {pipeline_mode = #tpu.pipeline_mode<synchronous>, transform_indices = @transform_3, window_bounds = array<i64: 128, 128>}, {pipeline_mode = #tpu.pipeline_mode<synchronous>, transform_indices = @transform_4, window_bounds = array<i64: 1, 128>}, {transform_indices = @transform_5, window_bounds = array<i64: 1, 1, 128>}]} {
    %c0 = arith.constant 0 : index
    %c0_0 = arith.constant 0 : index
    %c0_1 = arith.constant 0 : index
    %0 = vector.load %arg1[%c0, %c0_0, %c0_1] : memref<1x8x32xbf16, #tpu.memory_space<vmem>>, vector<1x8x32xbf16>
    %1 = vector.shape_cast %0 : vector<1x8x32xbf16> to vector<8x32xbf16>
    %c0_2 = arith.constant 0 : index
    %c0_3 = arith.constant 0 : index
    %c0_4 = arith.constant 0 : index
    %2 = vector.load %arg2[%c0_2, %c0_3, %c0_4] : memref<3x32x128xbf16, #tpu.memory_space<vmem>>, vector<1x32x128xbf16>
    %3 = vector.shape_cast %2 : vector<1x32x128xbf16> to vector<32x128xbf16>
    %cst = arith.constant dense<0.000000e+00> : vector<8x128xf32>
    %4 = tpu.matmul %1, %3, %cst {dimension_numbers = #tpu.dot_dimension_numbers<[1], [0], [0], [1], [0, 0, 1, 1], [], []>} : vector<8x32xbf16>, vector<32x128xbf16>, vector<8x128xf32> -> vector<8x128xf32>
    %5 = vector.shape_cast %4 : vector<8x128xf32> to vector<1x8x128xf32>
    %6 = vector.extract_strided_slice %5 {offsets = [0, 0, 0], sizes = [1, 6, 128], strides = [1, 1, 1]} : vector<1x8x128xf32> to vector<1x6x128xf32>
    %c1 = arith.constant 1 : index
    %c0_5 = arith.constant 0 : index
    %c0_6 = arith.constant 0 : index
    %7 = vector.load %arg2[%c1, %c0_5, %c0_6] : memref<3x32x128xbf16, #tpu.memory_space<vmem>>, vector<1x32x128xbf16>
    %8 = vector.shape_cast %7 : vector<1x32x128xbf16> to vector<32x128xbf16>
    %cst_7 = arith.constant dense<0.000000e+00> : vector<8x128xf32>
    %9 = tpu.matmul %1, %8, %cst_7 {dimension_numbers = #tpu.dot_dimension_numbers<[1], [0], [0], [1], [0, 0, 1, 1], [], []>} : vector<8x32xbf16>, vector<32x128xbf16>, vector<8x128xf32> -> vector<8x128xf32>
    %10 = vector.shape_cast %9 : vector<8x128xf32> to vector<1x8x128xf32>
    %11 = vector.extract_strided_slice %10 {offsets = [0, 1, 0], sizes = [1, 6, 128], strides = [1, 1, 1]} : vector<1x8x128xf32> to vector<1x6x128xf32>
    %12 = arith.addf %6, %11 : vector<1x6x128xf32>
    %c2 = arith.constant 2 : index
    %c0_8 = arith.constant 0 : index
    %c0_9 = arith.constant 0 : index
    %13 = vector.load %arg2[%c2, %c0_8, %c0_9] : memref<3x32x128xbf16, #tpu.memory_space<vmem>>, vector<1x32x128xbf16>
    %14 = vector.shape_cast %13 : vector<1x32x128xbf16> to vector<32x128xbf16>
    %cst_10 = arith.constant dense<0.000000e+00> : vector<8x128xf32>
    %15 = tpu.matmul %1, %14, %cst_10 {dimension_numbers = #tpu.dot_dimension_numbers<[1], [0], [0], [1], [0, 0, 1, 1], [], []>} : vector<8x32xbf16>, vector<32x128xbf16>, vector<8x128xf32> -> vector<8x128xf32>
    %16 = vector.shape_cast %15 : vector<8x128xf32> to vector<1x8x128xf32>
    %17 = vector.extract_strided_slice %16 {offsets = [0, 2, 0], sizes = [1, 6, 128], strides = [1, 1, 1]} : vector<1x8x128xf32> to vector<1x6x128xf32>
    %18 = arith.addf %12, %17 : vector<1x6x128xf32>
    %c0_11 = arith.constant 0 : index
    %c0_12 = arith.constant 0 : index
    %19 = vector.load %arg3[%c0_11, %c0_12] : memref<1x128xf32, #tpu.memory_space<vmem>>, vector<1x128xf32>
    %20 = vector.shape_cast %19 : vector<1x128xf32> to vector<1x1x128xf32>
    %21 = vector.broadcast %20 : vector<1x1x128xf32> to vector<1x6x128xf32>
    %22 = arith.addf %18, %21 : vector<1x6x128xf32>
    %cst_13 = arith.constant 0.000000e+00 : f32
    %23 = vector.broadcast %cst_13 : f32 to vector<1x6x128xf32>
    %24 = arith.maximumf %22, %23 : vector<1x6x128xf32>
    %cst_14 = arith.constant dense<0xFF800000> : vector<1x128xf32>
    %25 = vector.multi_reduction <maximumf>, %24, %cst_14 [1] : vector<1x6x128xf32> to vector<1x128xf32>
    %26 = arith.truncf %25 : vector<1x128xf32> to vector<1x128xbf16>
    %c0_15 = arith.constant 0 : index
    %c0_16 = arith.constant 0 : index
    %27 = vector.load %arg4[%c0_15, %c0_16] : memref<128x128xbf16, #tpu.memory_space<vmem>>, vector<128x128xbf16>
    %cst_17 = arith.constant dense<0.000000e+00> : vector<1x128xf32>
    %28 = tpu.matmul %26, %27, %cst_17 {dimension_numbers = #tpu.dot_dimension_numbers<[1], [0], [0], [1], [0, 0, 1, 1], [], []>} : vector<1x128xbf16>, vector<128x128xbf16>, vector<1x128xf32> -> vector<1x128xf32>
    %c0_18 = arith.constant 0 : index
    %c0_19 = arith.constant 0 : index
    %29 = vector.load %arg5[%c0_18, %c0_19] : memref<1x128xf32, #tpu.memory_space<vmem>>, vector<1x128xf32>
    %30 = arith.addf %28, %29 : vector<1x128xf32>
    %cst_20 = arith.constant dense<0xFF800000> : vector<1xf32>
    %31 = vector.multi_reduction <maximumf>, %30, %cst_20 [1] : vector<1x128xf32> to vector<1xf32>
    %32 = vector.shape_cast %31 : vector<1xf32> to vector<1x1xf32>
    %33 = vector.broadcast %32 : vector<1x1xf32> to vector<1x128xf32>
    %34 = arith.subf %30, %33 : vector<1x128xf32>
    %35 = math.exp %34 : vector<1x128xf32>
    %cst_21 = arith.constant dense<0.000000e+00> : vector<1xf32>
    %36 = vector.multi_reduction <add>, %35, %cst_21 [1] : vector<1x128xf32> to vector<1xf32>
    %37 = vector.shape_cast %36 : vector<1xf32> to vector<1x1xf32>
    %38 = vector.broadcast %37 : vector<1x1xf32> to vector<1x128xf32>
    %39 = arith.divf %35, %38 : vector<1x128xf32>
    %40 = vector.shape_cast %39 : vector<1x128xf32> to vector<1x1x128xf32>
    %c0_22 = arith.constant 0 : index
    %c0_23 = arith.constant 0 : index
    %c0_24 = arith.constant 0 : index
    %41 = vector.load %arg6[%c0_22, %c0_23, %c0_24] : memref<1x1x128xf32, #tpu.memory_space<vmem>>, vector<1x1x128xf32>
    tpu.vector_store %arg6[%c0_22, %c0_23, %c0_24], %40 {strides = array<i32>} : memref<1x1x128xf32, #tpu.memory_space<vmem>>, vector<1x1x128xf32>,
    return
  }
  func.func @transform_0(%arg0: i32) -> (i32, i32, i32) {
    %c0_i32 = arith.constant 0 : i32
    %c0_i32_0 = arith.constant 0 : i32
    %c0_i32_1 = arith.constant 0 : i32
    return %arg0, %c0_i32, %c0_i32_0 : i32, i32, i32
  }
  func.func @transform_1(%arg0: i32) -> (i32, i32, i32) {
    %c0_i32 = arith.constant 0 : i32
    %c0_i32_0 = arith.constant 0 : i32
    %c0_i32_1 = arith.constant 0 : i32
    %c0_i32_2 = arith.constant 0 : i32
    return %c0_i32, %c0_i32_0, %c0_i32_1 : i32, i32, i32
  }
  func.func @transform_2(%arg0: i32) -> (i32, i32) {
    %c0_i32 = arith.constant 0 : i32
    %c0_i32_0 = arith.constant 0 : i32
    %c0_i32_1 = arith.constant 0 : i32
    return %c0_i32, %c0_i32_0 : i32, i32
  }
  func.func @transform_3(%arg0: i32) -> (i32, i32) {
    %c0_i32 = arith.constant 0 : i32
    %c0_i32_0 = arith.constant 0 : i32
    %c0_i32_1 = arith.constant 0 : i32
    return %c0_i32, %c0_i32_0 : i32, i32
  }
  func.func @transform_4(%arg0: i32) -> (i32, i32) {
    %c0_i32 = arith.constant 0 : i32
    %c0_i32_0 = arith.constant 0 : i32
    %c0_i32_1 = arith.constant 0 : i32
    return %c0_i32, %c0_i32_0 : i32, i32
  }
  func.func @transform_5(%arg0: i32) -> (i32, i32, i32) {
    %c0_i32 = arith.constant 0 : i32
    %c0_i32_0 = arith.constant 0 : i32
    %c0_i32_1 = arith.constant 0 : i32
    return %arg0, %c0_i32, %c0_i32_0 : i32, i32, i32
  }
}

</mosaic_0001>

<bundles_post_ra>
// kernel: tpu_custom_call.1
= control target key start
LH: loop header
LB: loop body
LE: loop exit
PB: predicated region body
PF: predicated region fallthrough
CT: control target
= control target key end

     0   :  { %10 = vsyncpa [#allocation3], 0  ;;  %s1308_s0 = inlined_call_operand.hbm [shape: bf16[2,8,32], index: 0, kind: input, shape index: {}]   ;;  %s1309_s1 = inlined_call_operand.hbm [shape: bf16[3,32,128], index: 1, kind: input, shape index: {}]   ;;  %s1310_s2 = inlined_call_operand.vmem [shape: f32[1,128], index: 2, kind: input, shape index: {}]   ;;  %s1311_s3 = inlined_call_operand.hbm [shape: bf16[128,128], index: 3, kind: input, shape index: {}]   ;;  %s1312_s4 = inlined_call_operand.vmem [shape: f32[1,128], index: 4, kind: input, shape index: {}]   ;;  %s1313_s5 = inlined_call_operand.hbm [shape: f32[2,1,128], index: 5, kind: output, shape index: {}]  }
   0x1   :  { %12 = vsyncpa [#allocation3 + $0x1], 0 }
   0x2   :  { %13 = vsyncpa [#allocation6], 0 }
   0x3   :  { %14 = vsyncpa [#allocation4], 0 }
   0x4   :  { %16 = vsyncpa [#allocation4 + $0x1], 0  ;;  %s1065_s18 = smov 0   ;;  %s1067_s19 = smov 0  }
   0x5   :  { %s1069_s20 = smov 0   ;;  %s1071_s21 = smov 0  }
   0x6 LB: > { %s1086_s22 = sadd.s32 4294967295, %s1025_s21   ;;  %s686_s23 = sadd.s32 4294967294, %s1025_s21   ;;  %s1025_s21 = sphi %s1071_s21, %s1333_s21   ;;  %s1021_s20 = sphi %s1069_s20, %s1332_s20   ;;  %s1017_s19 = sphi %s1067_s19, %s1331_s19   ;;  %s1013_s18 = sphi %s1065_s18, %s1330_s18  }
   0x7   : > { %p42_p0 = scmp.ne.s32.totalorder %s1017_s19, %s1013_s18  ;;  %p1314_p1 = scmp.eq.s32.totalorder %s1086_s22, 0 }
   0x8   : > { %p156_p3 = scmp.eq.s32.totalorder %s686_s23, 1  ;;  %p687_p5 = scmp.ge.s32.totalorder %s1025_s21, 1 }
   0x9   : > { %p1095_p4 = por %p1314_p1, %p42_p0  ;;  %p163_p7 = scmp.lt.s32.totalorder %s1025_s21, 3 }
   0xa   : > { %p1100_p6 = por %p156_p3, %p42_p0  ;;  %s1027_s27 = smov [#allocation5]  }
   0xb   : > { %s1317_s24 = scalar_select %p1095_p4, 1, 0 }
   0xc   : > { %s1318_s25 = scalar_select %p1100_p6, 1, 0 }
   0xd   : > { %p1105_p8 = pnand %p687_p5, %p163_p7  ;;  %s175_s28 = sshll.u32 %s1027_s27, 4  ;;  %s1109_s28 = int_to_ptr.vmem [resolvable:$true] %s175_s28 }
   0xe   : > { %s1028_s30 = smov [#allocation7]   ;;  %s869_s9 = scalar_lea.hbm %s1309_s1, 768 }
   0xf   : > { %p792_p9 = pneg %p1105_p8  ;;  %s191_s6 = sshll.u32 %s1028_s30, 4  ;;  %s1120_s6 = int_to_ptr.vmem [resolvable:$true] %s191_s6 }
  0x10   : > { %p870_p12 = scmp.ne.s32.totalorder %s1309_s1, %s869_s9  ;;  %p876_p5 = scmp.lt.u32.totalorder %s869_s9, %s1309_s1 }
  0x11   : > { %p1116_p11 = pnand %p792_p9, %p1314_p1 }
  0x13   : > { %p871_p13 = pneg %p1116_p11 }
  0x15   : > { %p872_p0 = pnand %p871_p13, %p870_p12 }
  0x17   : > { %p873_p3 = pneg %p872_p0 }
  0x19   : > { %p878_p7 = pnand %p876_p5, %p873_p3 }
  0x1b   : > { %881 = shalt.err (!%p878_p7)
}
  0x1c   : > { %s882_s14 = scalar_lea.vmem %s1109_s28, 768  ;;  %p890_p2 = scmp.lt.s32.totalorder %s1109_s28, %s1109_s28 }
  0x1d   : > { %p883_p9 = scmp.ne.s32.totalorder %s1109_s28, %s882_s14  ;;  %p891_p12 = scmp.lt.s32.totalorder %s882_s14, %s882_s14 }
  0x1f   : > { %p885_p10 = pnand %p883_p9, %p871_p13  ;;  %p892_p0 = por %p891_p12, %p890_p2 }
  0x21   : > { %p886_p1 = pneg %p885_p10 }
  0x23   : > { %p893_p6 = pnand %p892_p0, %p886_p1 }
  0x25   : > { %896 = shalt.err (!%p893_p6)
}
  0x26   : > { %s1029_s15 = smov 64   ;;  %s1030_s16 = smov 4  }
  0x27   : > { %795 = dma.hbm_to_vmem [thread:$0]  (!%p1116_p11), %s1309_s1, 768, %s1109_s28, [#allocation6], %s1029_s15, %s1029_s15, %s1030_s16  }
  0x28   : > { %s897_s7 = scalar_lea.hbm %s1311_s3, 1024 }
  0x29   : > { %p898_p2 = scmp.ne.s32.totalorder %s1311_s3, %s897_s7  ;;  %p904_p10 = scmp.lt.u32.totalorder %s897_s7, %s1311_s3 }
  0x2b   : > { %p900_p1 = pnand %p898_p2, %p871_p13 }
  0x2d   : > { %p901_p6 = pneg %p900_p1 }
  0x2f   : > { %p906_p3 = pnand %p904_p10, %p901_p6 }
  0x31   : > { %909 = shalt.err (!%p906_p3)
}
  0x32   : > { %s910_s28 = scalar_lea.vmem %s1120_s6, 1024  ;;  %p918_p12 = scmp.lt.s32.totalorder %s1120_s6, %s1120_s6 }
  0x33   : > { %p911_p5 = scmp.ne.s32.totalorder %s1120_s6, %s910_s28  ;;  %p919_p0 = scmp.lt.s32.totalorder %s910_s28, %s910_s28 }
  0x35   : > { %p913_p7 = pnand %p911_p5, %p871_p13  ;;  %p920_p2 = por %p919_p0, %p918_p12 }
  0x37   : > { %p914_p9 = pneg %p913_p7 }
  0x39   : > { %p921_p1 = pnand %p920_p2, %p914_p9 }
  0x3b   : > { %924 = shalt.err (!%p921_p1)
}
  0x3c   : > { %798 = dma.hbm_to_vmem [thread:$0]  (!%p1116_p11), %s1311_s3, 1024, %s1120_s6, [#allocation6], %s1029_s15, %s1029_s15, %s1030_s16  }
  0x3d   : > { %s1175_s14 = sadd.s32 1, %s1025_s21   ;;  %s29_s29 = sadd.s32 1, %s1021_s20 }
  0x3e   : > { %s26_s17 = ssub.s32 %s1025_s21, %s1175_s14  ;;  %p36_p13 = scmp.ne.s32.totalorder %s1021_s20, %s1017_s19 }
  0x3f   : > { %p27_p6 = scmp.eq.s32.totalorder %s26_s17, 0  ;;  %p37_p10 = scmp.eq.s32.totalorder %s1025_s21, 0 }
  0x40   : > { %p1321_p3 = scmp.eq.s32.totalorder %s1086_s22, 1  ;;  %p809_p7 = scmp.lt.s32.totalorder %s1025_s21, 2 }
  0x41   : > { %s1191_s27 = scalar_select %p27_p6, %s1021_s20, %s29_s29  }
  0x42   : > { %p1185_p5 = por %p1321_p3, %p36_p13  ;;  %p38_p9 = por %p37_p10, %p36_p13 }
  0x43   : > { %s208_s30 = sand.u32 1, %s1021_s20   ;;  %s692_s6 = sshll.u32 %s1025_s21, 6 }
  0x44   : > { %s1322_s23 = scalar_select %p1185_p5, 1, 0 }
  0x45   : > { %s691_s7 = sshll.u32 %s208_s30, 2  ;;  %s1198_s8 = scalar_lea.hbm %s1308_s0, %s692_s6 }
  0x46   : > { %s212_s9 = scalar_lea.vmem [#allocation2], %s691_s7  ;;  %p1202_p11 = pnand %p809_p7, %p38_p9 }
  0x47   : > { %s219_s10 = sshll.u32 %s212_s9, 4  ;;  %s209_s28 = scalar_lea.sflag [#allocation3], %s208_s30  ;;  %s1200_s10 = int_to_ptr.vmem [resolvable:$true] %s219_s10 }
  0x48   : > { %s925_s12 = scalar_lea.hbm %s1198_s8, 64  ;;  %p927_p0 = pneg %p1202_p11 }
  0x49   : > { %p926_p12 = scmp.ne.s32.totalorder %s1198_s8, %s925_s12  ;;  %s930_s17 = scalar_lea.hbm %s1308_s0, 128 }
  0x4a   : > { %p931_p13 = scmp.lt.u32.totalorder %s1198_s8, %s1308_s0  ;;  %p932_p6 = scmp.lt.u32.totalorder %s930_s17, %s925_s12 }
  0x4b   : > { %p928_p2 = pnand %p927_p0, %p926_p12  ;;  %p934_p3 = scmp.lt.u32.totalorder %s925_s12, %s1198_s8 }
  0x4c   : > { %p933_p10 = por %p932_p6, %p931_p13 }
  0x4d   : > { %p929_p1 = pneg %p928_p2 }
  0x4e   : > { %p935_p7 = por %p934_p3, %p933_p10 }
  0x50   : > { %p936_p9 = pnand %p935_p7, %p929_p1 }
  0x52   : > { %939 = shalt.err (!%p936_p9)
}
  0x53   : > { %s940_s30 = scalar_lea.vmem %s1200_s10, 64  ;;  %s1031_s15 = smov [#allocation2]  }
  0x54   : > { %p941_p12 = scmp.ne.s32.totalorder %s1200_s10, %s940_s30  ;;  %s945_s16 = sshll.u32 %s1031_s15, 4  ;;  %s946_s16 = int_to_ptr.vmem [resolvable:$false] %s945_s16 }
  0x55   : > { %s947_s9 = scalar_lea.vmem %s946_s16, 128  ;;  %p948_p4 = scmp.lt.s32.totalorder %s1200_s10, %s946_s16 }
  0x56   : > { %p943_p2 = pnand %p941_p12, %p927_p0  ;;  %p949_p13 = scmp.lt.s32.totalorder %s947_s9, %s940_s30 }
  0x58   : > { %p944_p5 = pneg %p943_p2  ;;  %p950_p6 = por %p949_p13, %p948_p4 }
  0x5a   : > { %p951_p10 = pnand %p950_p6, %p944_p5 }
  0x5c   : > { %954 = shalt.err (!%p951_p10)
}
  0x5d   : > { %802 = dma.hbm_to_vmem [thread:$0]  (!%p1202_p11), %s1198_s8, 64, %s1200_s10, %s209_s28  }
  0x5e   : > { %228 = sbr.rel (%p1105_p8) target bundleno = 908 (0x38c), region = 40  ;;  %s1234_s12 = sand.u32 (!%p1105_p8), 1, %s1017_s19  }
  0x5f   : > { %s694_s13 = sshll.u32 (!%p1105_p8), %s1234_s12, 2  ;;  %s231_s29 = scalar_lea.sflag (!%p1105_p8), [#allocation3], %s1234_s12 }
  0x60   : > { %s234_s17 = scalar_lea.vmem (!%p1105_p8), [#allocation2], %s694_s13  ;;  %p1324_p4 = scmp.ne.s32.totalorder (!%p1105_p8), %s1317_s24, 0 }
  0x65   : > { %1000 = dma.done.wait (%p1324_p4), %s231_s29, 64  }
  0x66   : > { %1002 = vsyncadd (%p1324_p4), %s231_s29, 4294967232  ;;  %p1325_p5 = scmp.eq.s32.totalorder %s1086_s22, 0 }
  0x68   : > { %1004 = dma.done.wait (%p1325_p5), [#allocation6], 1792   ;;  %p1326_p11 = pmov %p1325_p5 }
  0x69   : > { %v1032_v0 = vmov 0.0   ;;  %vm1033_vm0 = vmmov 0   ;;  %v851_v1 = vld [vmem:[#allocation5] sm:$0xff]   ;;  %v852_v2 = vld [vmem:[#allocation5 + $0x8] sm:$0xff]   ;;  %v269_v3 = vld [vmem:[%s234_s17] sm:$0xf] }
  0x6a   : > { %1006 = vsyncadd (%p1326_p11), [#allocation6], 4294965504  ;;  %736 = vmatprep.subr.bf16.mxu0 %v1032_v0  ;;  %740 = vmatprep.mubr.msk.bf16.mxu0 %vm1033_vm0, %v1032_v0  ;;  %vm286_vm1 = vcmask 261120   ;;  %v853_v4 = vld [vmem:[#allocation5 + $0x10] sm:$0xff]   ;;  %v854_v5 = vld [vmem:[#allocation5 + $0x18] sm:$0xff]   ;;  %vm461_vm2 = vcmask 1045504  }
  0x6b   : > { %760 = vmatprep.subr.bf16.mxu1 %v1032_v0  ;;  %776 = vmatprep.mubr.msk.bf16.mxu1 %vm1033_vm0, %v1032_v0  ;;  %v855_v6 = vld [vmem:[#allocation5 + $0x20] sm:$0xff]   ;;  %v856_v7 = vld [vmem:[#allocation5 + $0x28] sm:$0xff]   ;;  %v857_v8 = vld [vmem:[#allocation7] sm:$0xff]   ;;  %vm575_vm3 = vcmask 1040384   ;;  %s715_s11 = sshll.u32 %s1086_s22, 4  ;;  %s267_s28 = scalar_lea.vmem [#allocation8], %s1234_s12 }
  0x6c   : > { %737 = vmatpush3.bf16.msra.mxu0 %v851_v1  ;;  %761 = vmatpush3.bf16.msra.mxu1 %v857_v8  ;;  %v858_v9 = vld [vmem:[#allocation7 + $0x8] sm:$0xff]   ;;  %v859_v10 = vld [vmem:[#allocation7 + $0x10] sm:$0xff]   ;;  %v860_v11 = vld [vmem:[#allocation7 + $0x18] sm:$0xff]   ;;  %s601_s7 = sshll.u32 %s267_s28, 4  ;;  %s1264_s15 = scalar_lea.hbm %s1313_s5, %s715_s11  ;;  %s1266_s7 = int_to_ptr.vmem [resolvable:$true] %s601_s7 }
  0x6d   : > { %738 = vmatprep.subr.bf16.mxu0 %v1032_v0  ;;  %762 = vmatprep.subr.bf16.mxu1 %v1032_v0  ;;  %v861_v12 = vld [vmem:[#allocation7 + $0x20] sm:$0xff]   ;;  %v862_v13 = vld [vmem:[#allocation7 + $0x28] sm:$0xff]   ;;  %v863_v14 = vld [vmem:[#allocation7 + $0x30] sm:$0xff]   ;;  %s589_s16 = scalar_lea.sflag [#allocation4], %s1234_s12  ;;  %s955_s9 = scalar_lea.vmem %s1266_s7, 16 }
  0x6e   : > { %v864_v15 = vld [vmem:[#allocation7 + $0x38] sm:$0xff]   ;;  %v706_v29 = vld [vmem:[%s1310_s2] ss:$0 sm:$0xff]  ;;  %p956_p8 = scmp.ne.s32.totalorder %s1266_s7, %s955_s9  ;;  %p1327_p0 = scmp.ne.s32.totalorder %s1322_s23, 0 }
  0x6f   : > { %v486_v43 = vld [vmem:[%s1312_s4] sm:$0x1]  ;;  %s1034_s22 = smov [#allocation8]  }
  0x70   : > { %739 = vmatpush3.bf16.msra.mxu0 %v852_v2  ;;  %763 = vmatpush3.bf16.msra.mxu1 %v858_v9  ;;  %p957_p1 = pnand %p956_p8, %p1327_p0  ;;  %s959_s13 = sshll.u32 %s1034_s22, 4  ;;  %s960_s13 = int_to_ptr.vmem [resolvable:$false] %s959_s13 }
  0x71   : > { %744 = vmatprep.subr.bf16.mxu0 %v1032_v0  ;;  %764 = vmatprep.subr.bf16.mxu1 %v1032_v0  ;;  %s961_s29 = scalar_lea.vmem %s960_s13, 32  ;;  %p962_p7 = scmp.lt.s32.totalorder %s1266_s7, %s960_s13 }
  0x72   : > { %p958_p3 = pneg %p957_p1  ;;  %p963_p9 = scmp.lt.s32.totalorder %s961_s29, %s955_s9 }
  0x73   : > { %741 = vmatmul.mubr.msk.bf16.vlgmr.msra.gmra.mrb[0].mxu0 %vm286_vm1, %v269_v3 }
  0x74   : > { %745 = vmatpush3.bf16.msra.mxu0 %v853_v4  ;;  %748 = vmatprep.mubr.msk.bf16.mxu0 %vm1033_vm0, %v1032_v0  ;;  %p964_p12 = por %p963_p9, %p962_p7 }
  0x75   : > { %746 = vmatprep.subr.bf16.mxu0 %v1032_v0  ;;  %765 = vmatpush3.bf16.msra.mxu1 %v859_v10 }
  0x76   : > { %766 = vmatprep.subr.bf16.mxu1 %v1032_v0  ;;  %p965_p2 = pnand %p964_p12, %p958_p3 }
  0x78   : > { %747 = vmatpush3.bf16.msra.mxu0 %v854_v5 }
  0x79   : > { %752 = vmatprep.subr.bf16.mxu0 %v1032_v0  ;;  %767 = vmatpush3.bf16.msra.mxu1 %v860_v11 }
  0x7a   : > { %768 = vmatprep.subr.bf16.mxu1 %v1032_v0 }
  0x7b   : > { %749 = vmatmul.mubr.msk.bf16.vlgmr.msra.gmra.mrb[4].mxu0 %vm286_vm1, %v269_v3 }
  0x7c   : > { %753 = vmatpush3.bf16.msra.mxu0 %v855_v6  ;;  %756 = vmatprep.mubr.msk.bf16.mxu0 %vm1033_vm0, %v1032_v0 }
  0x7d   : > { %754 = vmatprep.subr.bf16.mxu0 %v1032_v0  ;;  %769 = vmatpush3.bf16.msra.mxu1 %v861_v12 }
  0x7e   : > { %770 = vmatprep.subr.bf16.mxu1 %v1032_v0 }
  0x80   : > { %755 = vmatpush3.bf16.msra.mxu0 %v856_v7 }
  0x81   : > { %771 = vmatpush3.bf16.msra.mxu1 %v862_v13 }
  0x82   : > { %772 = vmatprep.subr.bf16.mxu1 %v1032_v0 }
  0x83   : > { %757 = vmatmul.mubr.msk.bf16.vlgmr.msra.gmra.mrb[8].mxu0 %vm286_vm1, %v269_v3 }
  0x85   : > { %773 = vmatpush3.bf16.msra.mxu1 %v863_v14 }
  0x86   : > { %774 = vmatprep.subr.bf16.mxu1 %v1032_v0 }
  0x89   : > { %775 = vmatpush3.bf16.msra.mxu1 %v864_v15 }
 0x146   : > { %v324_v16 = vpop.f32.mrb[0].mxu0 }
 0x147   : > { %v742_v17 = vpop.f32.mrb[1].mxu0 }
 0x148   : > { %v327_v18 = vpop.f32.mrb[2].mxu0 }
 0x149   : > { %v743_v19 = vpop.f32.mrb[3].mxu0 }
 0x14e   : > { %v381_v20 = vpop.f32.mrb[4].mxu0 }
 0x14f   : > { %v388_v21 = vrot.slane %v381_v20, 1  ;;  %v750_v22 = vpop.f32.mrb[5].mxu0 }
 0x150   : > { %v384_v23 = vpop.f32.mrb[6].mxu0 }
 0x151   : > { %v390_v24 = vadd.f32 %v388_v21, %v324_v16  ;;  %v751_v25 = vpop.f32.mrb[7].mxu0 }
 0x156   : > { %v442_v26 = vpop.f32.mrb[8].mxu0 }
 0x157   : > { %v449_v27 = vrot.slane %v442_v26, 2  ;;  %v758_v28 = vpop.f32.mrb[9].mxu0 }
 0x158   : > { %v445_v30 = vpop.f32.mrb[10].mxu0 }
 0x159   : > { %v451_v31 = vadd.f32 %v449_v27, %v390_v24  ;;  %v759_v32 = vpop.f32.mrb[11].mxu0 }
 0x15b   : > { %v459_v33 = vadd.f32 %v706_v29, %v451_v31 }
 0x15d   : > { %v460_v34 = vmax.f32 %v459_v33, 0.0 }
 0x15f   : > { %v462_v35 = vsel %vm461_vm2, %v460_v34, -inf }
 0x160   : > { %v463_v36 = vrot.slane %v462_v35, 4 }
 0x162   : > { %v464_v37 = vmax.f32 %v462_v35, %v463_v36 }
 0x164   : > { %v465_v38 = vrot.slane %v464_v37, 2 }
 0x166   : > { %v466_v39 = vmax.f32 %v464_v37, %v465_v38 }
 0x168   : > { %v467_v40 = vrot.slane %v466_v39, 1 }
 0x16a   : > { %v468_v41 = vmax.f32 %v466_v39, %v467_v40 }
 0x16c   : > { %v469_v42 = vpack.c.bf16 %v468_v41, %v468_v41 }
 0x16e   : > { %777 = vmatmul.mubr.bf16.vlgmr.msra.gmra.mrb[0].mxu1 %v469_v42 }
 0x241   : > { %v569_v44 = vpop.f32.mrb[0].mxu1 }
 0x242   : > { %v570_v45 = vadd.f32 %v569_v44, %v486_v43  ;;  %v778_v46 = vpop.f32.mrb[1].mxu1 }
 0x243   : > { %v572_v47 = vpop.f32.mrb[2].mxu1 }
 0x244   : > { %v779_v48 = vpop.f32.mrb[3].mxu1  ;;  %v576_v49 = vsel %vm575_vm3, %v570_v45, -inf }
 0x245   : > { %577 = vmax.xlane.f32.xlu0 %v576_v49 }
 0x2d2   : > { %v578_v50 = vpop.xlane.xlu0 %577 }
 0x2d3   : > { %v579_v51 = vsub.f32 %v570_v45, %v578_v50 }
 0x2d5   : > { %v580_v52 = vmul.f32 1.442695, %v579_v51 }
 0x2d7   : > { %865 = vpow2.f32 %v580_v52 }
 0x2e1   : > { %v866_v53 = vpop.eup %865 }
 0x2e2   : > { %v582_v54 = vsel %vm575_vm3, %v866_v53, 0.0 }
 0x2e3   : > { %583 = vadd.xlane.f32.xlu0 %v582_v54 }
 0x370   : > { %v584_v55 = vpop.xlane.xlu0 %583 }
 0x371   : > { %867 = vrcp.f32 %v584_v55 }
 0x37b   : > { %v868_v56 = vpop.eup %867 }
 0x37c   : > { %v586_v57 = vmul.f32 %v868_v56, %v866_v53 }
 0x37e   : > { %587 = vst [vmem:[%s267_s28] sm:$0x1] %v586_v57 }
 0x37f   : > { %968 = shalt.err (!%p965_p2)
}
 0x380   : > { %s969_s12 = scalar_lea.hbm %s1264_s15, 16  ;;  %s973_s26 = scalar_lea.hbm %s1313_s5, 32 }
 0x381   : > { %p970_p13 = scmp.ne.s32.totalorder %s1264_s15, %s969_s12  ;;  %p974_p4 = scmp.lt.u32.totalorder %s1264_s15, %s1313_s5 }
 0x382   : > { %p975_p5 = scmp.lt.u32.totalorder %s973_s26, %s969_s12  ;;  %p977_p8 = scmp.lt.u32.totalorder %s969_s12, %s1264_s15 }
 0x383   : > { %p971_p6 = pnand %p970_p13, %p1327_p0 }
 0x384   : > { %p976_p11 = por %p975_p5, %p974_p4 }
 0x385   : > { %p972_p10 = pneg %p971_p6 }
 0x386   : > { %p978_p1 = por %p977_p8, %p976_p11 }
 0x388   : > { %p979_p3 = pnand %p978_p1, %p972_p10 }
 0x38a   : > { %982 = shalt.err (!%p979_p3)
}
 0x38b   : > { %790 = dma.vmem_to_hbm [thread:$0]  (%p1327_p0), %s1266_s7, 16, %s1264_s15, %s589_s16  }
 0x38c PF: > { %s613_s11 = sand.u32 1, %s1013_s18   ;;  %p1328_p7 = scmp.ne.s32.totalorder %s1318_s25, 0 }
 0x38d   : > { %p1329_p9 = scmp.ge.s32.totalorder %s1025_s21, 2  ;;  %s614_s28 = scalar_lea.sflag [#allocation4], %s613_s11 }
 0x38f   : > { %p804_p12 = pnand %p1329_p9, %p1328_p7 }
 0x391   : > { %1008 = dma.done.wait (!%p804_p12), %s614_s28, 16  }
 0x392   : > { %1010 = vsyncadd (!%p804_p12), %s614_s28, 4294967280  ;;  %p19_p2 = scmp.ge.s32.totalorder %s1175_s14, 4   ;;  %s1330_s18 = smov %s1017_s19 }
 0x393   : > { %s1331_s19 = smov %s1021_s20  ;;  %s1332_s20 = smov %s1191_s27 }
 0x394   : > { %s1333_s21 = smov %s1175_s14  ;;  %21 = sbr.rel (!%p19_p2) target bundleno = 6 (0x6), region = 95 }
 0x39b   :  { %618 = vsyncpa [#allocation3], 1 }
 0x39c   :  { %620 = vsyncpa [#allocation3 + $0x1], 1 }
 0x39d   :  { %621 = vsyncpa [#allocation6], 1 }
 0x39e   :  { %622 = vsyncpa [#allocation4], 1 }
 0x39f   :  { %624 = vsyncpa [#allocation4 + $0x1], 1 }

</bundles_post_ra>
